<compile_context>
chip_gen: v6e
topology: v6e:2x2x1
jax: 0.10.0
libtpu: 0.0.40
codegen_flags: <defaults>
</compile_context>

<pallas_src>
import functools

import jax
import jax.numpy as jnp
import numpy as np
from jax import lax
from jax.experimental import pallas as pl
from jax.experimental.pallas import tpu as pltpu


def _round_up(v, m):
    return (v + m - 1) // m * m


def _choose_tile(hw, max_tile=1024):
    """Largest lane tile (multiple of 128, <= max_tile) that still leaves >= 2 grid
    steps whenever possible (keeps both v7x TensorCores busy)."""
    if hw <= 128:
        return 128
    tn = min(_round_up(max_tile, 128), _round_up(pl.cdiv(hw, 2), 128))
    return max(tn, 128)


def _detect_decode_kernel(nx, inv_nx, tn, write_raw,
                          x_ref, wt_ref, cp_ref, *out_refs):
    """One (batch, spatial-tile) step of one detection level, channel-major.

    x_ref  : (1, C, TN)  bf16  feature tile (spatial on the lane axis)
    wt_ref : (NC, C)     bf16  1x1 conv weight, transposed (NC = na*no)
    cp_ref : (NC, 8)     f32   per-channel constants:
                               [:,0] selx (c==0)      [:,1] sely (c==1)
                               [:,2] identity (c>=4)  [:,3] anchor*stride (c in {2,3})
                               [:,4] stride (c in {0,1})  [:,5] conv bias
    outs   : raw (1, NC, TN) f32 (optional), dec (1, NC, TN) f32
    """
    if write_raw:
        raw_ref, dec_ref = out_refs
    else:
        (dec_ref,) = out_refs

    selx = cp_ref[:, 0:1]
    sely = cp_ref[:, 1:2]
    m_id = cp_ref[:, 2:3]
    ag = cp_ref[:, 3:4]
    sxy = cp_ref[:, 4:5]
    bias = cp_ref[:, 5:6]

    # 1x1 conv as a channel-major matmul: (NC, C) @ (C, TN) -> (NC, TN).
    # bf16 operands, f32 accumulation on the MXU.
    acc = jnp.dot(wt_ref[...], x_ref[0], preferred_element_type=jnp.float32) + bias
    if write_raw:
        raw_ref[0] = acc

    s = jax.nn.sigmoid(acc)                       # EUP, f32

    # Per-lane grid coordinates, generated in-kernel (no extra HBM input stream).
    col = lax.broadcasted_iota(jnp.int32, (1, tn), 1) + pl.program_id(1) * tn
    xi = col % nx                                  # spatial x index
    gx = xi.astype(jnp.float32) - 0.5
    # exact y index without vector integer division: (col - xi) is a multiple of nx
    yi = ((col - xi).astype(jnp.float32) * inv_nx + 0.5).astype(jnp.int32)
    gy = yi.astype(jnp.float32) - 0.5

    # Pure multiply-add decode (masks baked into cp columns; no selects):
    #   c in {0,1}: (2s + g) * stride        (sxy = stride, g = gx or gy)
    #   c in {2,3}: (2s)^2 * anchor*stride   (ag nonzero only there)
    #   c >= 4    : s                        (m_id = 1 only there)
    s2 = s * 2.0
    g = gx * selx + gy * sely                      # (NC, TN)
    dec_ref[0] = s * m_id + (s2 + g) * sxy + (s2 * s2) * ag


def detect_level(x_nchw, w, b, anchors_i, stride, no, na, *,
                 max_tile=1024, return_raw=True):
    """Run one detection level through the Pallas kernel.

    x_nchw : (bs, C, ny, nx) f32   feature map
    w      : (na*no, C)      f32   1x1 conv weight (torch layout, squeezed)
    b      : (na*no,)        f32   conv bias
    Returns (z_i, raw5_i):
      z_i    : (bs, na*ny*nx, no)        decoded predictions
      raw5_i : (bs, na, ny, nx, no)      raw conv logits (None if return_raw=False)
    """
    bs, C, ny, nx = x_nchw.shape
    NC = na * no
    hw = ny * nx
    tn = _choose_tile(hw, max_tile)
    n_tiles = pl.cdiv(hw, tn)
    r_pad = n_tiles * tn

    # (bs, C, ny, nx) -> (bs, C, hw), pad spatial axis, cast matmul operand to bf16.
    xf = x_nchw.reshape(bs, C, hw)
    if r_pad != hw:
        xf = jnp.pad(xf, ((0, 0), (0, 0), (0, r_pad - hw)))
    xf = xf.astype(jnp.bfloat16)
    wt = jnp.asarray(w, jnp.float32).astype(jnp.bfloat16)          # (NC, C)

    # Per-channel decode constant table (NC, 8).
    cp_np = np.zeros((NC, 8), np.float32)
    for a in range(na):
        r0 = a * no
        cp_np[r0 + 0, 0] = 1.0                                     # select gx (c == 0)
        cp_np[r0 + 1, 1] = 1.0                                     # select gy (c == 1)
        cp_np[r0 + 4:r0 + no, 2] = 1.0                             # identity (c >= 4)
        cp_np[r0 + 2, 3] = float(anchors_i[a, 0]) * float(stride)  # anchor_w * stride
        cp_np[r0 + 3, 3] = float(anchors_i[a, 1]) * float(stride)  # anchor_h * stride
        cp_np[r0 + 0, 4] = float(stride)                           # xy scale
        cp_np[r0 + 1, 4] = float(stride)
    cp = jnp.asarray(cp_np).at[:, 5].set(jnp.asarray(b, jnp.float32).reshape(NC))

    kernel = functools.partial(_detect_decode_kernel, nx, 1.0 / float(nx), tn,
                               return_raw)

    out_shapes, out_specs = [], []
    if return_raw:
        out_shapes.append(jax.ShapeDtypeStruct((bs, NC, r_pad), jnp.float32))
        out_specs.append(pl.BlockSpec((1, NC, tn), lambda bb, tt: (bb, 0, tt)))
    out_shapes.append(jax.ShapeDtypeStruct((bs, NC, r_pad), jnp.float32))
    out_specs.append(pl.BlockSpec((1, NC, tn), lambda bb, tt: (bb, 0, tt)))

    outs = pl.pallas_call(
        kernel,
        out_shape=tuple(out_shapes),
        grid=(bs, n_tiles),
        in_specs=[pl.BlockSpec((1, C, tn), lambda bb, tt: (bb, 0, tt)),
                  pl.BlockSpec((NC, C), lambda bb, tt: (0, 0)),
                  pl.BlockSpec((NC, 8), lambda bb, tt: (0, 0))],
        out_specs=tuple(out_specs),
        compiler_params=pltpu.CompilerParams(
            dimension_semantics=("parallel", "parallel")),
    )(xf, wt, cp)

    if return_raw:
        raw_cm, dec_cm = outs
    else:
        (dec_cm,) = outs
        raw_cm = None

    def to5(y_cm):
        # (bs, na*no, r_pad) -> drop padding -> (bs, na, no, ny, nx) -> (bs, na, ny, nx, no)
        y = y_cm[:, :, :hw].reshape(bs, na, no, ny, nx)
        return jnp.transpose(y, (0, 1, 3, 4, 2))

    dec5 = to5(dec_cm)
    z = dec5.reshape(bs, na * ny * nx, no)
    raw5 = to5(raw_cm) if return_raw else None
    return z, raw5


def detect_forward(xs, ws, bss, anchors, strides, no, na, return_raw=True):
    """Full Detect.forward (inference, inplace, non-export): returns (cat(z, 1), [x_i])."""
    zs, raws = [], []
    for i, x in enumerate(xs):
        z, raw5 = detect_level(x, ws[i], bss[i], anchors[i], strides[i], no, na,
                               return_raw=return_raw)
        zs.append(z)
        raws.append(raw5)
    return jnp.concatenate(zs, axis=1), raws


def reference_forward(xs, ws, bss, anchors, strides, no, na,
                      matmul_dtype=jnp.float32):
    """Pure-JAX reference mirroring the PyTorch module (for verification).
    matmul_dtype lets us match the kernel's bf16-operand / f32-accumulate matmul."""
    zs, raws = [], []
    for i, x in enumerate(xs):
        bs, C, ny, nx = x.shape
        y = jnp.einsum("bchw,jc->bjhw",
                       x.astype(matmul_dtype), ws[i].astype(matmul_dtype),
                       preferred_element_type=jnp.float32)
        y = y + bss[i][None, :, None, None]
        y5 = jnp.transpose(y.reshape(bs, na, no, ny, nx), (0, 1, 3, 4, 2))
        raws.append(y5)
        s = jax.nn.sigmoid(y5)
        yv, xv = jnp.meshgrid(jnp.arange(ny, dtype=jnp.float32),
                              jnp.arange(nx, dtype=jnp.float32), indexing="ij")
        grid = jnp.stack([xv, yv], axis=-1) - 0.5                   # (ny, nx, 2)
        ag = jnp.asarray(anchors[i], jnp.float32) * strides[i]      # (na, 2)
        xy = (s[..., 0:2] * 2.0 + grid[None, None]) * strides[i]
        wh = (s[..., 2:4] * 2.0) ** 2 * ag[None, :, None, None, :]
        conf = s[..., 4:]
        yd = jnp.concatenate([xy, wh, conf], axis=-1)
        zs.append(yd.reshape(bs, -1, no))
    return jnp.concatenate(zs, axis=1), raws


if __name__ == "__main__":
    # Module configuration (small, consistent with Detect(nc=1, anchors=..., ch=...))
    nc = 1
    no = nc + 5                                   # 6
    anchors_cfg = ((10, 13, 16, 30, 33, 23),
                   (30, 61, 62, 45, 59, 119))
    nl = len(anchors_cfg)
    na = len(anchors_cfg[0]) // 2                 # 3
    anchors = np.asarray(anchors_cfg, np.float32).reshape(nl, na, 2)
    ch = (4, 8)
    strides = (8.0, 16.0)
    spatial = (16, 8)
    bs = 2

    key = jax.random.PRNGKey(0)
    keys = jax.random.split(key, 3 * nl)

    xs, ws, bss = [], [], []
    for i in range(nl):
        xs.append(jax.random.normal(keys[3 * i + 0],
                                    (bs, ch[i], spatial[i], spatial[i]), jnp.float32))
        # nn.Conv2d(ch[i], no*na, 1): weight (no*na, ch[i], 1, 1) squeezed -> (na*no, ch[i])
        ws.append(0.1 * jax.random.normal(keys[3 * i + 1],
                                          (na * no, ch[i]), jnp.float32))
        bss.append(0.1 * jax.random.normal(keys[3 * i + 2],
                                           (na * no,), jnp.float32))

    z, raw_list = detect_forward(xs, ws, bss, anchors, strides, no, na)
    z = jax.block_until_ready(z)
    raw_list = [jax.block_until_ready(r) for r in raw_list]

    assert z.shape == (bs, sum(na * s * s for s in spatial), no)
    for i, r in enumerate(raw_list):
        assert r.shape == (bs, na, spatial[i], spatial[i], no)

    # Verify against a reference that matches the kernel's matmul precision
    # (bf16 operands, f32 accumulation) — tight tolerance.
    z_bf, raw_bf = reference_forward(xs, ws, bss, anchors, strides, no, na,
                                     matmul_dtype=jnp.bfloat16)
    np.testing.assert_allclose(np.asarray(z), np.asarray(z_bf), rtol=1e-4, atol=1e-4)
    for r, rr in zip(raw_list, raw_bf):
        np.testing.assert_allclose(np.asarray(r), np.asarray(rr), rtol=1e-4, atol=1e-4)

    # Consistency with the full-f32 PyTorch-module semantics (loose tolerance: only the
    # bf16 matmul operands differ).
    z_f32, raw_f32 = reference_forward(xs, ws, bss, anchors, strides, no, na,
                                       matmul_dtype=jnp.float32)
    np.testing.assert_allclose(np.asarray(z), np.asarray(z_f32), rtol=3e-2, atol=3e-2)
    for r, rr in zip(raw_list, raw_f32):
        np.testing.assert_allclose(np.asarray(r), np.asarray(rr), rtol=3e-2, atol=3e-2)

    # Exercise the reduced-writeback path (decoded boxes only).
    z_nr, _ = detect_forward(xs, ws, bss, anchors, strides, no, na, return_raw=False)
    z_nr = jax.block_until_ready(z_nr)
    np.testing.assert_allclose(np.asarray(z_nr), np.asarray(z), rtol=1e-6, atol=1e-6)

    print("KERNEL_OK")
</pallas_src>

<mosaic_0001>
module attributes {stable_mosaic.version = 11 : i64} {
  func.func @_detect_decode_kernel(%arg0: i32, %arg1: i32, %arg2: memref<1x4x128xbf16, #tpu.memory_space<vmem>>, %arg3: memref<18x4xbf16, #tpu.memory_space<vmem>>, %arg4: memref<18x8xf32, #tpu.memory_space<vmem>>, %arg5: memref<1x18x128xf32, #tpu.memory_space<vmem>>, %arg6: memref<1x18x128xf32, #tpu.memory_space<vmem>>) attributes {dimension_semantics = [#tpu.dimension_semantics<parallel>, #tpu.dimension_semantics<parallel>], iteration_bounds = array<i64: 2, 2>, scalar_prefetch = 0 : i64, scratch_operands = 0 : i64, tpu.core_type = #tpu.core_type<tc>, window_params = [{transform_indices = @transform_0, window_bounds = array<i64: 1, 4, 128>}, {pipeline_mode = #tpu.pipeline_mode<synchronous>, transform_indices = @transform_1, window_bounds = array<i64: 18, 4>}, {pipeline_mode = #tpu.pipeline_mode<synchronous>, transform_indices = @transform_2, window_bounds = array<i64: 18, 8>}, {transform_indices = @transform_3, window_bounds = array<i64: 1, 18, 128>}, {transform_indices = @transform_4, window_bounds = array<i64: 1, 18, 128>}]} {
    %c0 = arith.constant 0 : index
    %c0_0 = arith.constant 0 : index
    %0 = vector.load %arg4[%c0, %c0_0] : memref<18x8xf32, #tpu.memory_space<vmem>>, vector<18x1xf32>
    %c0_1 = arith.constant 0 : index
    %c1 = arith.constant 1 : index
    %1 = vector.load %arg4[%c0_1, %c1] : memref<18x8xf32, #tpu.memory_space<vmem>>, vector<18x1xf32>
    %c0_2 = arith.constant 0 : index
    %c2 = arith.constant 2 : index
    %2 = vector.load %arg4[%c0_2, %c2] : memref<18x8xf32, #tpu.memory_space<vmem>>, vector<18x1xf32>
    %c0_3 = arith.constant 0 : index
    %c3 = arith.constant 3 : index
    %3 = vector.load %arg4[%c0_3, %c3] : memref<18x8xf32, #tpu.memory_space<vmem>>, vector<18x1xf32>
    %c0_4 = arith.constant 0 : index
    %c4 = arith.constant 4 : index
    %4 = vector.load %arg4[%c0_4, %c4] : memref<18x8xf32, #tpu.memory_space<vmem>>, vector<18x1xf32>
    %c0_5 = arith.constant 0 : index
    %c5 = arith.constant 5 : index
    %5 = vector.load %arg4[%c0_5, %c5] : memref<18x8xf32, #tpu.memory_space<vmem>>, vector<18x1xf32>
    %c0_6 = arith.constant 0 : index
    %c0_7 = arith.constant 0 : index
    %6 = vector.load %arg3[%c0_6, %c0_7] : memref<18x4xbf16, #tpu.memory_space<vmem>>, vector<18x4xbf16>
    %c0_8 = arith.constant 0 : index
    %c0_9 = arith.constant 0 : index
    %c0_10 = arith.constant 0 : index
    %7 = vector.load %arg2[%c0_8, %c0_9, %c0_10] : memref<1x4x128xbf16, #tpu.memory_space<vmem>>, vector<1x4x128xbf16>
    %8 = vector.shape_cast %7 : vector<1x4x128xbf16> to vector<4x128xbf16>
    %cst = arith.constant dense<0.000000e+00> : vector<18x128xf32>
    %9 = tpu.matmul %6, %8, %cst {dimension_numbers = #tpu.dot_dimension_numbers<[1], [0], [0], [1], [0, 0, 1, 1], [], []>} : vector<18x4xbf16>, vector<4x128xbf16>, vector<18x128xf32> -> vector<18x128xf32>
    %10 = vector.broadcast %5 : vector<18x1xf32> to vector<18x128xf32>
    %11 = arith.addf %9, %10 : vector<18x128xf32>
    %c0_11 = arith.constant 0 : index
    %c0_12 = arith.constant 0 : index
    %c0_13 = arith.constant 0 : index
    %12 = vector.load %arg5[%c0_11, %c0_12, %c0_13] : memref<1x18x128xf32, #tpu.memory_space<vmem>>, vector<1x18x128xf32>
    %13 = vector.shape_cast %12 : vector<1x18x128xf32> to vector<18x128xf32>
    %14 = vector.shape_cast %11 : vector<18x128xf32> to vector<1x18x128xf32>
    tpu.vector_store %arg5[%c0_11, %c0_12, %c0_13], %14 {strides = array<i32>} : memref<1x18x128xf32, #tpu.memory_space<vmem>>, vector<1x18x128xf32>,
    %15 = arith.negf %11 : vector<18x128xf32>
    %16 = math.exp %15 : vector<18x128xf32>
    %cst_14 = arith.constant 1.000000e+00 : f32
    %17 = vector.broadcast %cst_14 : f32 to vector<18x128xf32>
    %18 = arith.addf %17, %16 : vector<18x128xf32>
    %19 = arith.divf %17, %18 : vector<18x128xf32>
    %20 = tpu.iota {dimensions = array<i32: 1>} : vector<1x128xi32>
    %c128_i32 = arith.constant 128 : i32
    %21 = arith.muli %arg1, %c128_i32 : i32
    %22 = vector.broadcast %21 : i32 to vector<1x128xi32>
    %23 = arith.addi %20, %22 : vector<1x128xi32>
    %c16_i32 = arith.constant 16 : i32
    %c0_i32 = arith.constant 0 : i32
    %24 = arith.cmpi eq, %c16_i32, %c0_i32 : i32
    %c1_i32 = arith.constant 1 : i32
    %25 = arith.select %24, %c1_i32, %c16_i32 : i32
    %26 = vector.broadcast %25 : i32 to vector<1x128xi32>
    %27 = arith.remsi %23, %26 : vector<1x128xi32>
    %c0_i32_15 = arith.constant 0 : i32
    %28 = vector.broadcast %c0_i32_15 : i32 to vector<1x128xi32>
    %29 = arith.cmpi ne, %27, %28 : vector<1x128xi32>
    %c0_i32_16 = arith.constant 0 : i32
    %30 = vector.broadcast %c0_i32_16 : i32 to vector<1x128xi32>
    %31 = arith.cmpi slt, %27, %30 : vector<1x128xi32>
    %c0_i32_17 = arith.constant 0 : i32
    %32 = arith.cmpi slt, %25, %c0_i32_17 : i32
    %33 = vector.broadcast %32 : i1 to vector<1x128xi1>
    %34 = vector.broadcast %33 : vector<1x128xi1> to vector<1x128xi1>
    %35 = arith.xori %31, %34 : vector<1x128xi1>
    %36 = arith.andi %35, %29 : vector<1x128xi1>
    %37 = vector.broadcast %25 : i32 to vector<1x128xi32>
    %38 = arith.addi %27, %37 : vector<1x128xi32>
    %39 = arith.select %36, %38, %27 : vector<1x128xi1>, vector<1x128xi32>
    %40 = arith.sitofp %39 : vector<1x128xi32> to vector<1x128xf32>
    %cst_18 = arith.constant 5.000000e-01 : f32
    %41 = vector.broadcast %cst_18 : f32 to vector<1x128xf32>
    %42 = arith.subf %40, %41 : vector<1x128xf32>
    %43 = arith.subi %23, %39 : vector<1x128xi32>
    %44 = arith.sitofp %43 : vector<1x128xi32> to vector<1x128xf32>
    %cst_19 = arith.constant 6.250000e-02 : f32
    %45 = vector.broadcast %cst_19 : f32 to vector<1x128xf32>
    %46 = arith.mulf %44, %45 : vector<1x128xf32>
    %cst_20 = arith.constant 5.000000e-01 : f32
    %47 = vector.broadcast %cst_20 : f32 to vector<1x128xf32>
    %48 = arith.addf %46, %47 : vector<1x128xf32>
    %49 = arith.fptosi %48 : vector<1x128xf32> to vector<1x128xi32>
    %50 = arith.sitofp %49 : vector<1x128xi32> to vector<1x128xf32>
    %cst_21 = arith.constant 5.000000e-01 : f32
    %51 = vector.broadcast %cst_21 : f32 to vector<1x128xf32>
    %52 = arith.subf %50, %51 : vector<1x128xf32>
    %cst_22 = arith.constant 2.000000e+00 : f32
    %53 = vector.broadcast %cst_22 : f32 to vector<18x128xf32>
    %54 = arith.mulf %19, %53 : vector<18x128xf32>
    %55 = vector.broadcast %42 : vector<1x128xf32> to vector<18x128xf32>
    %56 = vector.broadcast %0 : vector<18x1xf32> to vector<18x128xf32>
    %57 = arith.mulf %55, %56 : vector<18x128xf32>
    %58 = vector.broadcast %52 : vector<1x128xf32> to vector<18x128xf32>
    %59 = vector.broadcast %1 : vector<18x1xf32> to vector<18x128xf32>
    %60 = arith.mulf %58, %59 : vector<18x128xf32>
    %61 = arith.addf %57, %60 : vector<18x128xf32>
    %62 = vector.broadcast %2 : vector<18x1xf32> to vector<18x128xf32>
    %63 = arith.mulf %19, %62 : vector<18x128xf32>
    %64 = arith.addf %54, %61 : vector<18x128xf32>
    %65 = vector.broadcast %4 : vector<18x1xf32> to vector<18x128xf32>
    %66 = arith.mulf %64, %65 : vector<18x128xf32>
    %67 = arith.addf %63, %66 : vector<18x128xf32>
    %68 = arith.mulf %54, %54 : vector<18x128xf32>
    %69 = vector.broadcast %3 : vector<18x1xf32> to vector<18x128xf32>
    %70 = arith.mulf %68, %69 : vector<18x128xf32>
    %71 = arith.addf %67, %70 : vector<18x128xf32>
    %c0_23 = arith.constant 0 : index
    %c0_24 = arith.constant 0 : index
    %c0_25 = arith.constant 0 : index
    %72 = vector.load %arg6[%c0_23, %c0_24, %c0_25] : memref<1x18x128xf32, #tpu.memory_space<vmem>>, vector<1x18x128xf32>
    %73 = vector.shape_cast %72 : vector<1x18x128xf32> to vector<18x128xf32>
    %74 = vector.shape_cast %71 : vector<18x128xf32> to vector<1x18x128xf32>
    tpu.vector_store %arg6[%c0_23, %c0_24, %c0_25], %74 {strides = array<i32>} : memref<1x18x128xf32, #tpu.memory_space<vmem>>, vector<1x18x128xf32>,
    return
  }
  func.func @transform_0(%arg0: i32, %arg1: i32) -> (i32, i32, i32) {
    %c0_i32 = arith.constant 0 : i32
    %c0_i32_0 = arith.constant 0 : i32
    return %arg0, %c0_i32, %arg1 : i32, i32, i32
  }
  func.func @transform_1(%arg0: i32, %arg1: i32) -> (i32, i32) {
    %c0_i32 = arith.constant 0 : i32
    %c0_i32_0 = arith.constant 0 : i32
    %c0_i32_1 = arith.constant 0 : i32
    return %c0_i32, %c0_i32_0 : i32, i32
  }
  func.func @transform_2(%arg0: i32, %arg1: i32) -> (i32, i32) {
    %c0_i32 = arith.constant 0 : i32
    %c0_i32_0 = arith.constant 0 : i32
    %c0_i32_1 = arith.constant 0 : i32
    return %c0_i32, %c0_i32_0 : i32, i32
  }
  func.func @transform_3(%arg0: i32, %arg1: i32) -> (i32, i32, i32) {
    %c0_i32 = arith.constant 0 : i32
    %c0_i32_0 = arith.constant 0 : i32
    return %arg0, %c0_i32, %arg1 : i32, i32, i32
  }
  func.func @transform_4(%arg0: i32, %arg1: i32) -> (i32, i32, i32) {
    %c0_i32 = arith.constant 0 : i32
    %c0_i32_0 = arith.constant 0 : i32
    return %arg0, %c0_i32, %arg1 : i32, i32, i32
  }
}

</mosaic_0001>

<bundles_post_ra>
// kernel: tpu_custom_call.1
= control target key start
LH: loop header
LB: loop body
LE: loop exit
PB: predicated region body
PF: predicated region fallthrough
CT: control target
= control target key end

     0   :  { %s875_s15 = smov 0   ;;  %s877_s16 = smov 0   ;;  %s1007_s0 = inlined_call_operand.vmem [shape: bf16[2,4,256], index: 0, kind: input, shape index: {}]   ;;  %s1008_s1 = inlined_call_operand.vmem [shape: bf16[18,4], index: 1, kind: input, shape index: {}]   ;;  %s1009_s2 = inlined_call_operand.vmem [shape: f32[18,8], index: 2, kind: input, shape index: {}]   ;;  %s1010_s3 = inlined_call_operand.vmem [shape: f32[2,18,256], index: 3, kind: output, shape index: {0}]   ;;  %s1011_s4 = inlined_call_operand.vmem [shape: f32[2,18,256], index: 4, kind: output, shape index: {1}]  }
   0x1   :  { %s879_s17 = smov 0   ;;  %s881_s18 = smov 0  }
   0x2   :  { %s883_s19 = smov 0   ;;  %s885_s20 = smov 0  }
   0x3   :  { %s887_s21 = smov 0  }
   0x4 LB: > { %s24_s22 = sadd.s32 1, %s834_s19  ;;  %s27_s23 = sadd.s32 1, %s838_s20  ;;  %s842_s21 = sphi %s887_s21, %s15_s21   ;;  %s838_s20 = sphi %s885_s20, %s1018_s20   ;;  %s834_s19 = sphi %s883_s19, %s1017_s19   ;;  %s830_s18 = sphi %s881_s18, %s1016_s18   ;;  %s826_s17 = sphi %s879_s17, %s1015_s17   ;;  %s822_s16 = sphi %s877_s16, %s1014_s16   ;;  %s818_s15 = sphi %s875_s15, %s1013_s15  }
   0x5   : > { %p25_p0 = scmp.ge.s32.totalorder %s24_s22, 2  ;;  %s663_s24 = sadd.s32 4294967295, %s842_s21  }
   0x6   : > { %p116_p1 = scmp.ne.s32.totalorder %s822_s16, %s818_s15  ;;  %p117_p2 = scmp.eq.s32.totalorder %s663_s24, 3 }
   0x7   : > { %s1020_s22 = smov (%p25_p0, %s24_s22), 0  ;;  %s1022_s23 = smov (!%p25_p0, %s27_s23), %s838_s20 }
   0x8   : > { %s102_s25 = ssub.s32 %s834_s19, %s1020_s22  ;;  %p29_p3 = scmp.ge.s32.totalorder %s1022_s23, 2 }
   0x9   : > { %p667_p4 = scmp.ge.s32.totalorder %s842_s21, 1  ;;  %p921_p5 = por %p117_p2, %p116_p1 }
   0xa   : > { %p186_p6 = scmp.lt.s32.totalorder %s842_s21, 5  ;;  %s1024_s23 = smov (%p29_p3, %s1022_s23), 0 }
   0xb   : > { %s101_s27 = ssub.s32 %s838_s20, %s1024_s23  ;;  %s106_s29 = sadd.s32 1, %s822_s16 }
   0xc   : > { %p187_p7 = pnand %p667_p4, %p186_p6  ;;  %s103_s28 = sor.u32 %s102_s25, %s101_s27 }
   0xd   : > { %p104_p8 = scmp.eq.s32.totalorder %s103_s28, 0  ;;  %p218_p9 = scmp.lt.s32.totalorder (!%p187_p7), %s830_s18, 1 }
   0xe   : > { %190 = sbr.rel (%p187_p7) target bundleno = 283 (0x11b), region = 32  ;;  %p220_p10 = scmp.lt.s32.totalorder (!%p187_p7), %s826_s17, 1 }
   0xf   : > { %s932_s30 = scalar_select %p104_p8, %s822_s16, %s106_s29  }
  0x10   : > { %s677_s8 = sshll.u32 (!%p187_p7), %s826_s17, 7  ;;  %s209_s9 = sand.u32 (!%p187_p7), 1, %s818_s15  }
  0x13   : > { %v774_v0 = vld [vmem:[%s1008_s1] sm:$0xff]   ;;  %vm257_vm0 = vcmask 31744   ;;  %s219_s7 = scalar_select %p218_p9, %s830_s18, 1  ;;  %v844_v1 = vmov 5   ;;  %v229_v2 = vld [vmem:[%s1009_s2 + $0x10] sm:$0x3]  ;;  %v337_v13 = vlaneseq  ;;  %v340_v15 = vstv %s677_s8 }
  0x14   : > { %690 = vmatprep.mubr.msk.bf16.mxu0 %vm257_vm0, %v774_v0  ;;  %763 = vset.pattern.permute.xlu1 %v844_v1  ;;  %s221_s10 = scalar_select %p220_p10, %s826_s17, 1  ;;  %v227_v3 = vld [vmem:[%s1009_s2] sm:$0xff]  ;;  %v228_v4 = vld [vmem:[%s1009_s2 + $0x8] sm:$0xff]  ;;  %vm264_vm1 = vcmask 1041408   ;;  %v845_v5 = vmov 0   ;;  %v846_v9 = vmov 1  }
  0x15   : > { %246 = vperm.xlu1 %763, %v229_v2   ;;  %762 = vset.pattern.permute.xlu0 %v844_v1  ;;  %s668_s13 = sshll.u32 %s219_s7, 1  ;;  %v775_v8 = vld [vmem:[%s1008_s1 + $0x8] ss:$0 sps:$4 sm:$0x11]   ;;  %v847_v10 = vmov 2   ;;  %v848_v11 = vmov 4  }
  0x16   : > { %236 = vperm.xlu0 %762, %v227_v3   ;;  %s223_s14 = sadd.s32 %s668_s13, %s221_s10  ;;  %v849_v12 = vmov 3   ;;  %v338_v14 = vand.u32 127, %v337_v13  ;;  %s960_s10 = smul.u32 24, %s209_s9 }
  0x17   : > { %s669_s27 = sshll.u32 %s223_s14, 1  ;;  %s698_s12 = smul.u32 (%p921_p5), 6, %s830_s18 }
  0x18   : > { %s225_s5 = scalar_lea.vmem %s1007_s0, %s669_s27  ;;  %v341_v16 = vadd.s32 %v340_v15, %v338_v14  ;;  %s963_s11 = scalar_lea.vmem [#allocation2], %s960_s10 }
  0x19   : > { %764 = vset.pattern.permute.xlu1 %v845_v5  ;;  %v233_v6 = vld [vmem:[%s225_s5] sm:$0x3]  ;;  %s217_s15 = scalar_lea.vmem [#allocation3], %s960_s10  ;;  %s471_s13 = sadd.s32 (%p921_p5), %s826_s17, %s698_s12 }
  0x1a   : > { %367 = vperm.xlu1 %764, %v227_v3   ;;  %241 = vperm.xlu0 %762, %v228_v4   ;;  %v266_v7 = vsel %vm264_vm1, %v233_v6, 0  ;;  %v343_v17 = vsub.s32 0, %v341_v16  ;;  %vm342_vm2 = vcmp.lt.s32.totalorder %v341_v16, 0  ;;  %s681_s14 = sshll.u32 (%p921_p5), %s471_s13, 3 }
  0x1b   : > { %694 = vmatprep.subr.msk.bf16.mxu0 %vm264_vm1, %v233_v6  ;;  %s473_s27 = scalar_lea.vmem (%p921_p5), %s1010_s3, %s681_s14 }
  0x1c   : > { %689 = vmatpush3.bf16.msra.mxu0 %v266_v7  ;;  %v678_v18 = vmin.u32 %v343_v17, %v341_v16 }
  0x1e   : > { %375 = vperm.xlu1 %764, %v229_v2   ;;  %765 = vset.pattern.permute.xlu0 %v845_v5  ;;  %v346_v19 = vand.u32 15, %v678_v18 }
  0x1f   : > { %691 = vmatmul.mubr.msk.bf16.vlgmr.msra.gmra.mxu0 %vm257_vm0, %v775_v8  ;;  %371 = vperm.xlu0 %765, %v228_v4  }
  0x20   : > { %v347_v21 = vsub.s32 0, %v346_v19 }
  0x22   : > { %766 = vset.pattern.permute.xlu1 %v846_v9  ;;  %v348_v23 = vsel %vm342_vm2, %v347_v21, %v346_v19 }
  0x23   : > { %382 = vperm.xlu1 %766, %v227_v3   ;;  %767 = vset.pattern.permute.xlu0 %v846_v9  ;;  %vm349_vm3 = vcmp.ne.s32.totalorder %v348_v23, 0  ;;  %vm350_vm4 = vcmp.lt.s32.totalorder %v348_v23, 0  ;;  %v352_v24 = vadd.s32 16, %v348_v23 }
  0x24   : > { %386 = vperm.xlu0 %767, %v228_v4   ;;  %vm351_vm5 = vmand %vm350_vm4, %vm349_vm3 }
  0x25   : > { %v353_v26 = vsel %vm351_vm5, %v352_v24, %v348_v23 }
  0x26   : > { %v356_v28 = vsub.s32 %v341_v16, %v353_v26  ;;  %v354_v54 = vcvt.s32.f32 %v353_v26 }
  0x27   : > { %390 = vperm.xlu1 %766, %v229_v2  }
  0x28   : > { %769 = vset.pattern.permute.xlu0 %v847_v10  ;;  %v357_v34 = vcvt.s32.f32 %v356_v28  ;;  %v679_v60 = vadd.f32 -0.5, %v354_v54 }
  0x29   : > { %404 = vperm.xlu0 %769, %v228_v4  }
  0x2a   : > { %v358_v41 = vmul.f32 0.0625, %v357_v34 }
  0x2b   : > { %768 = vset.pattern.permute.xlu1 %v847_v10 }
  0x2c   : > { %400 = vperm.xlu1 %768, %v227_v3   ;;  %v359_v45 = vadd.f32 0.5, %v358_v41 }
  0x2d   : > { %771 = vset.pattern.permute.xlu0 %v848_v11 }
  0x2e   : > { %422 = vperm.xlu0 %771, %v228_v4   ;;  %v696_v47 = vtrunc.f32 %v359_v45 }
  0x30   : > { %408 = vperm.xlu1 %768, %v229_v2   ;;  %v697_v50 = vcvt.f32.s32 %v696_v47 }
  0x32   : > { %773 = vset.pattern.permute.xlu0 %v849_v12  ;;  %v361_v55 = vcvt.s32.f32 %v697_v50 }
  0x33   : > { %443 = vperm.xlu0 %773, %v228_v4  }
  0x34   : > { %770 = vset.pattern.permute.xlu1 %v848_v11  ;;  %v680_v61 = vadd.f32 -0.5, %v361_v55 }
  0x35   : > { %418 = vperm.xlu1 %770, %v227_v3  }
  0x39   : > { %426 = vperm.xlu1 %770, %v229_v2  }
  0x3d   : > { %772 = vset.pattern.permute.xlu1 %v849_v12 }
  0x3e   : > { %439 = vperm.xlu1 %772, %v227_v3  }
  0x42   : > { %447 = vperm.xlu1 %772, %v229_v2  }
  0x90   : > { %v247_v20 = vpop.permute.xlu1 %246 }
  0x91   : > { %v237_v29 = vpop.permute.xlu0 %236 }
  0x95   : > { %v368_v22 = vpop.permute.xlu1 %367  ;;  %v242_v39 = vpop.permute.xlu0 %241 }
  0x96   : > { %v378_v2 = vmul.f32 %v679_v60, %v368_v22 }
  0x99   : > { %v376_v25 = vpop.permute.xlu1 %375 }
  0x9a   : > { %v372_v56 = vpop.permute.xlu0 %371  ;;  %v380_v63 = vmul.f32 %v679_v60, %v376_v25 }
  0x9b   : > { %v379_v13 = vmul.f32 %v679_v60, %v372_v56 }
  0x9e   : > { %v383_v27 = vpop.permute.xlu1 %382 }
  0x9f   : > { %v387_v62 = vpop.permute.xlu0 %386  ;;  %v393_v3 = vmul.f32 %v680_v61, %v383_v27 }
  0xa0   : > { %v394_v14 = vmul.f32 %v680_v61, %v387_v62 }
  0xa1   : > { %v396_v9 = vadd.f32 %v393_v3, %v378_v2 }
  0xa2   : > { %v391_v37 = vpop.permute.xlu1 %390  ;;  %v397_v26 = vadd.f32 %v394_v14, %v379_v13 }
  0xa3   : > { %v395_v0 = vmul.f32 %v680_v61, %v391_v37 }
  0xa4   : > { %v405_v4 = vpop.permute.xlu0 %404 }
  0xa5   : > { %v398_v6 = vadd.f32 %v395_v0, %v380_v63 }
  0xa7   : > { %v401_v43 = vpop.permute.xlu1 %400 }
  0xab   : > { %v409_v46 = vpop.permute.xlu1 %408 }
  0xb0   : > { %v419_v52 = vpop.permute.xlu1 %418 }
  0xb4   : > { %v427_v59 = vpop.permute.xlu1 %426 }
  0xb9   : > { %v440_v1 = vpop.permute.xlu1 %439 }
  0xbd   : > { %v448_v15 = vpop.permute.xlu1 %447 }
  0xdf   : > { %v692_v30 = vpop.f32.mrf.mxu0 }
  0xe0   : > { %v311_v31 = vadd.f32 %v692_v30, %v247_v20  ;;  %v423_v20 = vpop.permute.xlu0 %422 }
  0xe1   : > { %v302_v32 = vpop.f32.mrf.mxu0 }
  0xe2   : > { %318 = vst [vmem:[%s963_s11 + $0x10] sm:$0x3] %v311_v31  ;;  %v676_v33 = vmul.f32 -1.442695, %v311_v31  ;;  %v303_v35 = vadd.f32 %v302_v32, %v237_v29 }
  0xe3   : > { %v693_v36 = vpop.f32.mrf.mxu0 }
  0xe4   : > { %776 = vpow2.f32 %v676_v33  ;;  %316 = vst [vmem:[%s963_s11] sm:$0xff] %v303_v35  ;;  %v674_v38 = vmul.f32 -1.442695, %v303_v35  ;;  %v444_v34 = vpop.permute.xlu0 %443 }
  0xe5   : > { %v305_v40 = vpop.f32.mrf.mxu0 }
  0xe6   : > { %778 = vpow2.f32 %v674_v38  ;;  %v306_v42 = vadd.f32 %v305_v40, %v242_v39 }
  0xe8   : > { %317 = vst [vmem:[%s963_s11 + $0x8] sm:$0xff] %v306_v42  ;;  %v675_v44 = vmul.f32 -1.442695, %v306_v42 }
  0xe9   : > { %v510_v42 = vld [vmem:[%s963_s11 + $0x10] sm:$0xff] (%p921_p5) }
  0xea   : > { %780 = vpow2.f32 %v675_v44  ;;  %511 = vst [vmem:[%s473_s27 + $0x20] sm:$0xff] (%p921_p5), %v510_v42 }
  0xeb   : > { %v506_v40 = vld [vmem:[%s963_s11] sm:$0xff] (%p921_p5) }
  0xec   : > { %507 = vst [vmem:[%s473_s27] sm:$0xff] (%p921_p5), %v506_v40 }
  0xef   : > { %v508_v41 = vld [vmem:[%s963_s11 + $0x8] sm:$0xff] (%p921_p5) }
  0xf0   : > { %509 = vst [vmem:[%s473_s27 + $0x10] sm:$0xff] (%p921_p5), %v508_v41 }
  0xf1   : > { %v777_v48 = vpop.eup %776 }
  0xf2   : > { %v330_v49 = vadd.f32 1.0, %v777_v48 }
  0xf3   : > { %v779_v51 = vpop.eup %778 }
  0xf4   : > { %782 = vrcp.f32 %v330_v49  ;;  %v328_v53 = vadd.f32 1.0, %v779_v51 }
  0xf6   : > { %784 = vrcp.f32 %v328_v53 }
  0xf7   : > { %v781_v57 = vpop.eup %780 }
  0xf8   : > { %v329_v58 = vadd.f32 1.0, %v781_v57 }
  0xfa   : > { %786 = vrcp.f32 %v329_v58 }
 0x101   : > { %v783_v5 = vpop.eup %782 }
 0x102   : > { %v365_v7 = vmul.f32 2.0, %v783_v5  ;;  %v413_v16 = vmul.f32 %v783_v5, %v409_v46 }
 0x103   : > { %v785_v8 = vpop.eup %784 }
 0x104   : > { %v363_v10 = vmul.f32 2.0, %v785_v8  ;;  %v416_v11 = vadd.f32 %v398_v6, %v365_v7  ;;  %v437_v12 = vmul.f32 %v365_v7, %v365_v7  ;;  %v411_v22 = vmul.f32 %v785_v8, %v401_v43 }
 0x106   : > { %v414_v17 = vadd.f32 %v396_v9, %v363_v10  ;;  %v431_v18 = vmul.f32 %v427_v59, %v416_v11  ;;  %v435_v19 = vmul.f32 %v363_v10, %v363_v10  ;;  %v452_v25 = vmul.f32 %v448_v15, %v437_v12 }
 0x107   : > { %v787_v21 = vpop.eup %786 }
 0x108   : > { %v429_v23 = vmul.f32 %v419_v52, %v414_v17  ;;  %v434_v24 = vadd.f32 %v431_v18, %v413_v16  ;;  %v364_v27 = vmul.f32 2.0, %v787_v21  ;;  %v450_v29 = vmul.f32 %v440_v1, %v435_v19 }
 0x109   : > { %v412_v35 = vmul.f32 %v787_v21, %v405_v4 }
 0x10a   : > { %v432_v28 = vadd.f32 %v429_v23, %v411_v22  ;;  %v455_v30 = vadd.f32 %v452_v25, %v434_v24  ;;  %v415_v31 = vadd.f32 %v397_v26, %v364_v27  ;;  %v436_v32 = vmul.f32 %v364_v27, %v364_v27 }
 0x10c   : > { %v453_v33 = vadd.f32 %v450_v29, %v432_v28  ;;  %458 = vst [vmem:[%s217_s15 + $0x10] sm:$0x3] %v455_v30  ;;  %v430_v36 = vmul.f32 %v423_v20, %v415_v31  ;;  %v451_v38 = vmul.f32 %v444_v34, %v436_v32 }
 0x10e   : > { %456 = vst [vmem:[%s217_s15] sm:$0xff] %v453_v33  ;;  %v433_v37 = vadd.f32 %v430_v36, %v412_v35  ;;  %469 = sbr.rel (!%p921_p5) target bundleno = 275 (0x113), region = 36 }
 0x110   : > { %v454_v39 = vadd.f32 %v451_v38, %v433_v37 }
 0x112   : > { %457 = vst [vmem:[%s217_s15 + $0x8] sm:$0xff] %v454_v39 }
 0x113 PF: > { %517 = sbr.rel (!%p921_p5) target bundleno = 283 (0x11b), region = 74  ;;  %v558_v45 = vld [vmem:[%s217_s15 + $0x10] sm:$0xff] (%p921_p5) }
 0x114   : > { %s699_s28 = smul.u32 (%p921_p5), 6, %s830_s18 }
 0x115   : > { %v554_v43 = vld [vmem:[%s217_s15] sm:$0xff] (%p921_p5) }
 0x116   : > { %s519_s29 = sadd.s32 (%p921_p5), %s826_s17, %s699_s28 }
 0x117   : > { %s682_s5 = sshll.u32 (%p921_p5), %s519_s29, 3 }
 0x118   : > { %s521_s8 = scalar_lea.vmem %s1011_s4, %s682_s5 }
 0x119   : > { %v556_v44 = vld [vmem:[%s217_s15 + $0x8] sm:$0xff]  ;;  %555 = vst [vmem:[%s521_s8] sm:$0xff] %v554_v43  ;;  %559 = vst [vmem:[%s521_s8 + $0x20] sm:$0xff] %v558_v45 }
 0x11a   : > { %557 = vst [vmem:[%s521_s8 + $0x10] sm:$0xff] %v556_v44 }
 0x11b PF: > { %s15_s21 = sadd.s32 1, %s842_s21   ;;  %s1013_s15 = smov %s822_s16 }
 0x11c   : > { %p12_p11 = scmp.ge.s32.totalorder %s15_s21, 6   ;;  %s1014_s16 = smov %s932_s30 }
 0x11d   : > { %s1015_s17 = smov %s834_s19  ;;  %s1016_s18 = smov %s838_s20 }
 0x11e   : > { %s1017_s19 = smov %s1020_s22  ;;  %s1018_s20 = smov %s1024_s23 }
 0x11f   :  { %14 = sbr.rel (!%p12_p11) target bundleno = 4 (0x4), region = 150 }

</bundles_post_ra>
